<compile_context>
chip_gen: v6e
topology: v6e:2x2x1
jax: 0.10.0
libtpu: 0.0.40
codegen_flags: <defaults>
</compile_context>

<pallas_src>
import jax
import jax.numpy as jnp
from jax.experimental import pallas as pl
from jax.experimental.pallas import tpu as pltpu

_EPS = 1e-4


def _round_up(x, m):
    return (x + m - 1) // m * m


def _tpu_params():
    """(tensorcores per device, VMEM capacity bytes) with safe fallbacks."""
    ncores = 1
    vmem_cap = 64 * 1024 * 1024                 # conservative (v7x per-TC VMEM)
    try:
        kind = jax.devices()[0].device_kind.lower()
    except Exception:
        kind = ""
    if ("v7" in kind) or ("v4" in kind) or ("v5p" in kind):
        ncores = 2                              # megacore / dual-TC parts
    if ("v5" in kind) or ("v6" in kind):
        vmem_cap = 128 * 1024 * 1024            # v5e / v6e physical VMEM
    try:
        vmem_cap = int(pltpu.get_tpu_info().vmem_capacity_bytes)
    except Exception:
        pass
    return ncores, vmem_cap


def _pool_to(x, H, W):
    """Integer-ratio adaptive max pool: (B, Hin, Win) -> (B, H*W).

    Done in the wrapper (one XLA pass reading full-res, writing pooled),
    so the kernel only ever streams the small pooled planes.
    """
    B, Hin, Win = x.shape
    kh, kw = Hin // H, Win // W
    if kh == 1 and kw == 1:
        return x.reshape(B, H * W)              # pure reshape, no data movement
    x = x.reshape(B, H, kh, W, kw)
    x = jnp.max(x, axis=(2, 4))
    return x.reshape(B, H * W)


def reg_l1_loss(output, mask, target):
    N, C, H, W = output.shape
    assert mask.shape[:2] == (N, C) and target.shape[:2] == (N, C), \
        "kernel assumes mask/target share the NC dims of output"
    Hm, Wm = mask.shape[2:]
    Ht, Wt = target.shape[2:]
    # TODO(synk): PyTorch adaptive_max_pool2d with non-integer ratios uses
    # variable window sizes; only integer downsampling ratios are handled here.
    assert Hm % H == 0 and Wm % W == 0 and Ht % H == 0 and Wt % W == 0

    B = N * C
    P = H * W

    # Pre-pooled, lane-dense (B, P) planes in their native dtypes.
    out2 = output.reshape(B, P)
    msk2 = _pool_to(mask.reshape(B, Hm, Wm), H, W)
    tgt2 = _pool_to(target.reshape(B, Ht, Wt), H, W)

    # --- generation-aware VMEM budgeting -----------------------------------
    ncores_hw, vmem_cap = _tpu_params()
    vmem_limit = min(vmem_cap * 3 // 4, 64 * 1024 * 1024)   # 48 MiB v7x, 64 MiB v5e/v6e
    budget = vmem_limit * 3 // 5                            # headroom for compiler temps

    itemsz = out2.dtype.itemsize + msk2.dtype.itemsize + tgt2.dtype.itemsize
    per_b = P * (2 * itemsz        # double-buffered input blocks
                 + 2 * 4           # resident f32 accumulators
                 + 4 * 4)          # f32 elementwise temporaries (o, m, t, |diff|)
    tb_budget = max(8, (budget // per_b) // 8 * 8)

    # Batch-tile size: multiple of 8 sublanes, never larger than the array
    # (so only the standard partial-last-block overhang can occur).
    if B <= 8:
        tb = B                                            # full-dim block
    else:
        share = _round_up(pl.cdiv(B, ncores_hw), 8)
        tb = max(8, min(tb_budget, share, (B // 8) * 8))

    nblocks = pl.cdiv(B, tb)
    ncores = max(1, min(ncores_hw, nblocks))
    nb = pl.cdiv(nblocks, ncores)
    last_block = nblocks - 1
    # Tail masking is needed when the last block overhangs B or the core split
    # over-covers the block range (duplicated, fully-masked blocks).
    needs_mask = (nblocks * tb != B) or (ncores * nb != nblocks)

    def kernel(out_ref, mask_ref, targ_ref, abs_ref, msk_ref, acc_abs, acc_msk):
        c = pl.program_id(0)
        b = pl.program_id(1)

        @pl.when(b == 0)
        def _():
            acc_abs[...] = jnp.zeros_like(acc_abs)
            acc_msk[...] = jnp.zeros_like(acc_msk)

        o = out_ref[...].astype(jnp.float32)
        m = mask_ref[...].astype(jnp.float32)
        t = targ_ref[...].astype(jnp.float32)

        # |o*m - t*m| == |(o - t) * m| (= |m|*|o - t|), saves one multiply.
        abs_term = jnp.abs((o - t) * m)
        msk_term = m
        if needs_mask:
            # Over-hanging / duplicated blocks hold unspecified tail data;
            # select (not multiply) so NaN/Inf garbage cannot leak in.
            row = (jax.lax.broadcasted_iota(jnp.int32, o.shape, 0)
                   + (c * nb + b) * tb)
            valid = row < B
            abs_term = jnp.where(valid, abs_term, 0.0)
            msk_term = jnp.where(valid, msk_term, 0.0)

        acc_abs[...] += abs_term
        acc_msk[...] += msk_term

        @pl.when(b == pl.num_programs(1) - 1)
        def _():
            abs_ref[...] = jnp.full(abs_ref.shape, jnp.sum(acc_abs[...]),
                                    dtype=abs_ref.dtype)
            msk_ref[...] = jnp.full(msk_ref.shape, jnp.sum(acc_msk[...]),
                                    dtype=msk_ref.dtype)

    def in_index(c, b):
        # Clamp so the DMA never starts past the array; logical (unclamped)
        # row indices are re-derived in-kernel for the validity mask.
        return (jnp.minimum(c * nb + b, last_block), 0)

    part = jax.ShapeDtypeStruct((ncores, 8, 128), jnp.float32)

    abs_part, msk_part = pl.pallas_call(
        kernel,
        out_shape=(part, part),
        grid_spec=pltpu.PrefetchScalarGridSpec(
            num_scalar_prefetch=0,
            grid=(ncores, nb),
            in_specs=[
                pl.BlockSpec((tb, P), in_index),
                pl.BlockSpec((tb, P), in_index),
                pl.BlockSpec((tb, P), in_index),
            ],
            out_specs=(
                pl.BlockSpec((1, 8, 128), lambda c, b: (c, 0, 0)),
                pl.BlockSpec((1, 8, 128), lambda c, b: (c, 0, 0)),
            ),
            scratch_shapes=[pltpu.VMEM((tb, P), jnp.float32),
                            pltpu.VMEM((tb, P), jnp.float32)],
        ),
        compiler_params=pltpu.CompilerParams(
            dimension_semantics=("parallel", "arbitrary"),
            vmem_limit_bytes=int(vmem_limit)),
    )(out2, msk2, tgt2)

    abs_sum = jnp.sum(abs_part[:, 0, 0])
    msk_sum = jnp.sum(msk_part[:, 0, 0])
    return abs_sum / (msk_sum + _EPS)


def _reference(output, mask, target):
    """Pure-JAX reference mirroring the PyTorch forward (integer ratios)."""
    N, C, H, W = output.shape

    def pool(x):
        B, Cc, Hin, Win = x.shape
        kh, kw = Hin // H, Win // W
        return x.reshape(B, Cc, H, kh, W, kw).max(axis=(3, 5))

    t = pool(target.astype(jnp.float32))
    m = pool(mask.astype(jnp.float32))
    o = output.astype(jnp.float32)
    loss = jnp.sum(jnp.abs(o * m - t * m))
    return loss / (jnp.sum(m) + 0.0001)


if __name__ == "__main__":
    key = jax.random.PRNGKey(0)
    k1, k2, k3 = jax.random.split(key, 3)

    N, C, H, W = 2, 4, 16, 16          # output resolution
    Hin, Win = 32, 32                  # mask / target resolution (2x2 pooling)

    output = jax.random.normal(k1, (N, C, H, W), dtype=jnp.float32)
    mask = (jax.random.uniform(k2, (N, C, Hin, Win)) < 0.3).astype(jnp.float32)
    target = jax.random.normal(k3, (N, C, Hin, Win), dtype=jnp.float32)

    loss = jax.block_until_ready(reg_l1_loss(output, mask, target))
    ref = jax.block_until_ready(_reference(output, mask, target))
    assert jnp.allclose(loss, ref, rtol=1e-5, atol=1e-5), (loss, ref)

    print("KERNEL_OK")
</pallas_src>

<mosaic_0001>
module attributes {stable_mosaic.version = 11 : i64} {
  func.func @kernel(%arg0: i32, %arg1: i32, %arg2: memref<8x256xf32, #tpu.memory_space<vmem>>, %arg3: memref<8x256xf32, #tpu.memory_space<vmem>>, %arg4: memref<8x256xf32, #tpu.memory_space<vmem>>, %arg5: memref<1x8x128xf32, #tpu.memory_space<vmem>>, %arg6: memref<1x8x128xf32, #tpu.memory_space<vmem>>, %arg7: memref<8x256xf32, #tpu.memory_space<vmem>>, %arg8: memref<8x256xf32, #tpu.memory_space<vmem>>) attributes {dimension_semantics = [#tpu.dimension_semantics<parallel>, #tpu.dimension_semantics<arbitrary>], iteration_bounds = array<i64: 1, 1>, scalar_prefetch = 0 : i64, scratch_operands = 2 : i64, tpu.core_type = #tpu.core_type<tc>, window_params = [{transform_indices = @transform_0, window_bounds = array<i64: 8, 256>}, {transform_indices = @transform_1, window_bounds = array<i64: 8, 256>}, {transform_indices = @transform_2, window_bounds = array<i64: 8, 256>}, {transform_indices = @transform_3, window_bounds = array<i64: 1, 8, 128>}, {transform_indices = @transform_4, window_bounds = array<i64: 1, 8, 128>}]} {
    %c0_i32 = arith.constant 0 : i32
    %0 = arith.cmpi eq, %arg1, %c0_i32 : i32
    %1 = arith.extui %0 : i1 to i32
    %c0_i32_0 = arith.constant 0 : i32
    %2 = arith.cmpi ne, %1, %c0_i32_0 : i32
    scf.if %2 {
      %cst = arith.constant 0.000000e+00 : f32
      %18 = vector.broadcast %cst : f32 to vector<8x256xf32>
      %c0_16 = arith.constant 0 : index
      %c0_17 = arith.constant 0 : index
      %19 = vector.load %arg7[%c0_16, %c0_17] : memref<8x256xf32, #tpu.memory_space<vmem>>, vector<8x256xf32>
      tpu.vector_store %arg7[%c0_16, %c0_17], %18 {strides = array<i32>} : memref<8x256xf32, #tpu.memory_space<vmem>>, vector<8x256xf32>,
      %cst_18 = arith.constant 0.000000e+00 : f32
      %20 = vector.broadcast %cst_18 : f32 to vector<8x256xf32>
      %c0_19 = arith.constant 0 : index
      %c0_20 = arith.constant 0 : index
      %21 = vector.load %arg8[%c0_19, %c0_20] : memref<8x256xf32, #tpu.memory_space<vmem>>, vector<8x256xf32>
      tpu.vector_store %arg8[%c0_19, %c0_20], %20 {strides = array<i32>} : memref<8x256xf32, #tpu.memory_space<vmem>>, vector<8x256xf32>,
    } else {
    }
    %c0 = arith.constant 0 : index
    %c0_1 = arith.constant 0 : index
    %3 = vector.load %arg2[%c0, %c0_1] : memref<8x256xf32, #tpu.memory_space<vmem>>, vector<8x256xf32>
    %c0_2 = arith.constant 0 : index
    %c0_3 = arith.constant 0 : index
    %4 = vector.load %arg3[%c0_2, %c0_3] : memref<8x256xf32, #tpu.memory_space<vmem>>, vector<8x256xf32>
    %c0_4 = arith.constant 0 : index
    %c0_5 = arith.constant 0 : index
    %5 = vector.load %arg4[%c0_4, %c0_5] : memref<8x256xf32, #tpu.memory_space<vmem>>, vector<8x256xf32>
    %6 = arith.subf %3, %5 : vector<8x256xf32>
    %7 = arith.mulf %6, %4 : vector<8x256xf32>
    %8 = math.absf %7 : vector<8x256xf32>
    %c0_6 = arith.constant 0 : index
    %c0_7 = arith.constant 0 : index
    %9 = vector.load %arg7[%c0_6, %c0_7] : memref<8x256xf32, #tpu.memory_space<vmem>>, vector<8x256xf32>
    %10 = arith.addf %9, %8 : vector<8x256xf32>
    %c0_8 = arith.constant 0 : index
    %c0_9 = arith.constant 0 : index
    %11 = vector.load %arg7[%c0_8, %c0_9] : memref<8x256xf32, #tpu.memory_space<vmem>>, vector<8x256xf32>
    tpu.vector_store %arg7[%c0_8, %c0_9], %10 {strides = array<i32>} : memref<8x256xf32, #tpu.memory_space<vmem>>, vector<8x256xf32>,
    %c0_10 = arith.constant 0 : index
    %c0_11 = arith.constant 0 : index
    %12 = vector.load %arg8[%c0_10, %c0_11] : memref<8x256xf32, #tpu.memory_space<vmem>>, vector<8x256xf32>
    %13 = arith.addf %12, %4 : vector<8x256xf32>
    %c0_12 = arith.constant 0 : index
    %c0_13 = arith.constant 0 : index
    %14 = vector.load %arg8[%c0_12, %c0_13] : memref<8x256xf32, #tpu.memory_space<vmem>>, vector<8x256xf32>
    tpu.vector_store %arg8[%c0_12, %c0_13], %13 {strides = array<i32>} : memref<8x256xf32, #tpu.memory_space<vmem>>, vector<8x256xf32>,
    %c0_i32_14 = arith.constant 0 : i32
    %15 = arith.cmpi eq, %arg1, %c0_i32_14 : i32
    %16 = arith.extui %15 : i1 to i32
    %c0_i32_15 = arith.constant 0 : i32
    %17 = arith.cmpi ne, %16, %c0_i32_15 : i32
    scf.if %17 {
      %c0_16 = arith.constant 0 : index
      %c0_17 = arith.constant 0 : index
      %18 = vector.load %arg7[%c0_16, %c0_17] : memref<8x256xf32, #tpu.memory_space<vmem>>, vector<8x256xf32>
      %19 = vector.shape_cast %18 : vector<8x256xf32> to vector<1x8x256xf32>
      %cst = arith.constant dense<0.000000e+00> : vector<1xf32>
      %20 = vector.multi_reduction <add>, %19, %cst [1, 2] : vector<1x8x256xf32> to vector<1xf32>
      %21 = vector.shape_cast %20 : vector<1xf32> to vector<1x1x1xf32>
      %22 = vector.extract %21[0, 0, 0] : f32 from vector<1x1x1xf32>
      %23 = vector.broadcast %22 : f32 to vector<1x8x128xf32>
      %c0_18 = arith.constant 0 : index
      %c0_19 = arith.constant 0 : index
      %c0_20 = arith.constant 0 : index
      %24 = vector.load %arg5[%c0_18, %c0_19, %c0_20] : memref<1x8x128xf32, #tpu.memory_space<vmem>>, vector<1x8x128xf32>
      tpu.vector_store %arg5[%c0_18, %c0_19, %c0_20], %23 {strides = array<i32>} : memref<1x8x128xf32, #tpu.memory_space<vmem>>, vector<1x8x128xf32>,
      %c0_21 = arith.constant 0 : index
      %c0_22 = arith.constant 0 : index
      %25 = vector.load %arg8[%c0_21, %c0_22] : memref<8x256xf32, #tpu.memory_space<vmem>>, vector<8x256xf32>
      %26 = vector.shape_cast %25 : vector<8x256xf32> to vector<1x8x256xf32>
      %cst_23 = arith.constant dense<0.000000e+00> : vector<1xf32>
      %27 = vector.multi_reduction <add>, %26, %cst_23 [1, 2] : vector<1x8x256xf32> to vector<1xf32>
      %28 = vector.shape_cast %27 : vector<1xf32> to vector<1x1x1xf32>
      %29 = vector.extract %28[0, 0, 0] : f32 from vector<1x1x1xf32>
      %30 = vector.broadcast %29 : f32 to vector<1x8x128xf32>
      %c0_24 = arith.constant 0 : index
      %c0_25 = arith.constant 0 : index
      %c0_26 = arith.constant 0 : index
      %31 = vector.load %arg6[%c0_24, %c0_25, %c0_26] : memref<1x8x128xf32, #tpu.memory_space<vmem>>, vector<1x8x128xf32>
      tpu.vector_store %arg6[%c0_24, %c0_25, %c0_26], %30 {strides = array<i32>} : memref<1x8x128xf32, #tpu.memory_space<vmem>>, vector<1x8x128xf32>,
    } else {
    }
    return
  }
  func.func @transform_0(%arg0: i32, %arg1: i32) -> (i32, i32) {
    %c1_i32 = arith.constant 1 : i32
    %0 = arith.muli %arg0, %c1_i32 : i32
    %1 = arith.addi %0, %arg1 : i32
    %c0_i32 = arith.constant 0 : i32
    %2 = arith.minsi %1, %c0_i32 : i32
    %c0_i32_0 = arith.constant 0 : i32
    %c0_i32_1 = arith.constant 0 : i32
    return %2, %c0_i32_0 : i32, i32
  }
  func.func @transform_1(%arg0: i32, %arg1: i32) -> (i32, i32) {
    %c1_i32 = arith.constant 1 : i32
    %0 = arith.muli %arg0, %c1_i32 : i32
    %1 = arith.addi %0, %arg1 : i32
    %c0_i32 = arith.constant 0 : i32
    %2 = arith.minsi %1, %c0_i32 : i32
    %c0_i32_0 = arith.constant 0 : i32
    %c0_i32_1 = arith.constant 0 : i32
    return %2, %c0_i32_0 : i32, i32
  }
  func.func @transform_2(%arg0: i32, %arg1: i32) -> (i32, i32) {
    %c1_i32 = arith.constant 1 : i32
    %0 = arith.muli %arg0, %c1_i32 : i32
    %1 = arith.addi %0, %arg1 : i32
    %c0_i32 = arith.constant 0 : i32
    %2 = arith.minsi %1, %c0_i32 : i32
    %c0_i32_0 = arith.constant 0 : i32
    %c0_i32_1 = arith.constant 0 : i32
    return %2, %c0_i32_0 : i32, i32
  }
  func.func @transform_3(%arg0: i32, %arg1: i32) -> (i32, i32, i32) {
    %c0_i32 = arith.constant 0 : i32
    %c0_i32_0 = arith.constant 0 : i32
    %c0_i32_1 = arith.constant 0 : i32
    return %arg0, %c0_i32, %c0_i32_0 : i32, i32, i32
  }
  func.func @transform_4(%arg0: i32, %arg1: i32) -> (i32, i32, i32) {
    %c0_i32 = arith.constant 0 : i32
    %c0_i32_0 = arith.constant 0 : i32
    %c0_i32_1 = arith.constant 0 : i32
    return %arg0, %c0_i32, %c0_i32_0 : i32, i32, i32
  }
}

</mosaic_0001>

<bundles_post_ra>
// kernel: tpu_custom_call.1
= control target key start
LH: loop header
LB: loop body
LE: loop exit
PB: predicated region body
PF: predicated region fallthrough
CT: control target
= control target key end

     0   :  { %10 = vsyncpa [#allocation5], 0  ;;  %s341_s0 = inlined_call_operand.hbm [shape: f32[8,256], index: 0, kind: input, shape index: {}]   ;;  %s342_s1 = inlined_call_operand.hbm [shape: f32[8,256], index: 1, kind: input, shape index: {}]   ;;  %s343_s2 = inlined_call_operand.hbm [shape: f32[8,256], index: 2, kind: input, shape index: {}]   ;;  %s344_s3 = inlined_call_operand.hbm [shape: f32[1,8,128], index: 3, kind: output, shape index: {0}]   ;;  %s345_s4 = inlined_call_operand.hbm [shape: f32[1,8,128], index: 4, kind: output, shape index: {1}]  }
   0x1   :  { %11 = vsyncpa [#allocation8], 0 }
   0x2   :  { %12 = vsyncpa [#allocation6], 0 }
   0x3   :  { %13 = vsyncpa [#allocation12], 0  ;;  %s296_s15 = smov [#allocation7]   ;;  %s297_s17 = smov [#allocation4]  }
   0x4   :  { %s42_s16 = sshll.u32 %s296_s15, 4  ;;  %s26_s18 = sshll.u32 %s297_s17, 4  ;;  %s43_s16 = int_to_ptr.vmem [resolvable:$true] %s42_s16  ;;  %s27_s18 = int_to_ptr.vmem [resolvable:$true] %s26_s18 }
   0x5   :  { %s196_s19 = scalar_lea.vmem %s43_s16, 256  ;;  %p201_p1 = scmp.lt.s32.totalorder %s43_s16, %s43_s16 }
   0x6   :  { %p197_p0 = scmp.ne.s32.totalorder %s43_s16, %s196_s19  ;;  %p202_p2 = scmp.lt.s32.totalorder %s196_s19, %s196_s19 }
   0x8   :  { %p203_p3 = por %p202_p2, %p201_p1 }
   0xa   :  { %p204_p4 = pnand %p203_p3, %p197_p0 }
   0xc   :  { %207 = shalt.err (!%p204_p4)
}
   0xd   :  { %45 = dma.hbm_to_vmem [thread:$0]  %s342_s1, 256, %s43_s16, [#allocation8]  }
   0xe   :  { %s216_s22 = scalar_lea.vmem %s27_s18, 256  ;;  %p221_p6 = scmp.lt.s32.totalorder %s27_s18, %s27_s18 }
   0xf   :  { %p217_p5 = scmp.ne.s32.totalorder %s27_s18, %s216_s22  ;;  %p222_p7 = scmp.lt.s32.totalorder %s216_s22, %s216_s22 }
  0x11   :  { %p223_p8 = por %p222_p7, %p221_p6 }
  0x13   :  { %p224_p9 = pnand %p223_p8, %p217_p5 }
  0x15   :  { %227 = shalt.err (!%p224_p9)
}
  0x16   :  { %29 = dma.hbm_to_vmem [thread:$0]  %s341_s0, 256, %s27_s18, [#allocation5]  }
  0x17   :  { %s298_s25 = smov [#allocation9]  }
  0x18   :  { %s58_s26 = sshll.u32 %s298_s25, 4  ;;  %s59_s26 = int_to_ptr.vmem [resolvable:$true] %s58_s26 }
  0x19   :  { %s236_s27 = scalar_lea.vmem %s59_s26, 256  ;;  %p241_p11 = scmp.lt.s32.totalorder %s59_s26, %s59_s26 }
  0x1a   :  { %p237_p10 = scmp.ne.s32.totalorder %s59_s26, %s236_s27  ;;  %p242_p12 = scmp.lt.s32.totalorder %s236_s27, %s236_s27 }
  0x1c   :  { %p243_p13 = por %p242_p12, %p241_p11 }
  0x1e   :  { %p244_p0 = pnand %p243_p13, %p237_p10 }
  0x20   :  { %247 = shalt.err (!%p244_p0)
}
  0x21   :  { %61 = dma.hbm_to_vmem [thread:$0]  %s343_s2, 256, %s59_s26, [#allocation8]  }
  0x22   :  { %288 = dma.done.wait [#allocation5], 256  }
  0x23   :  { %289 = vsyncadd [#allocation5], 4294967040 }
  0x24   :  { %290 = dma.done.wait [#allocation8], 512  }
  0x25   :  { %291 = vsyncadd [#allocation8], 4294966784  ;;  %v88_v0 = vld [vmem:[#allocation4] sm:$0xff]  ;;  %v89_v1 = vld [vmem:[#allocation4 + $0x8] sm:$0xff]  ;;  %s299_s0 = smov [#allocation10]   ;;  %s300_s30 = smov [#allocation11]  }
  0x26   :  { %v90_v2 = vld [vmem:[#allocation7] sm:$0xff]  ;;  %v91_v3 = vld [vmem:[#allocation7 + $0x8] sm:$0xff]  ;;  %v92_v4 = vld [vmem:[#allocation9] sm:$0xff]  ;;  %s149_s2 = sshll.u32 %s299_s0, 4  ;;  %s159_s5 = sshll.u32 %s300_s30, 4  ;;  %s150_s2 = int_to_ptr.vmem [resolvable:$true] %s149_s2  ;;  %s160_s5 = int_to_ptr.vmem [resolvable:$true] %s159_s5 }
  0x27   :  { %v93_v5 = vld [vmem:[#allocation9 + $0x8] sm:$0xff]  ;;  %v94_v6 = vsub.f32 %v88_v0, %v92_v4  ;;  %v131_v13 = vadd.f32 %v91_v3, %v90_v2  ;;  %s248_s6 = scalar_lea.vmem %s150_s2, 128  ;;  %p253_p2 = scmp.lt.s32.totalorder %s150_s2, %s150_s2 }
  0x28   :  { %v95_v7 = vsub.f32 %v89_v1, %v93_v5  ;;  %p249_p1 = scmp.ne.s32.totalorder %s150_s2, %s248_s6  ;;  %p254_p3 = scmp.lt.s32.totalorder %s248_s6, %s248_s6 }
  0x29   :  { %v96_v8 = vmul.f32 %v94_v6, %v90_v2 }
  0x2a   :  { %v97_v9 = vmul.f32 %v95_v7, %v91_v3  ;;  %p255_p4 = por %p254_p3, %p253_p2 }
  0x2b   :  { %v98_v10 = vand.u32 2147483647, %v96_v8 }
  0x2c   :  { %v99_v11 = vand.u32 2147483647, %v97_v9  ;;  %p256_p5 = pnand %p255_p4, %p249_p1 }
  0x2e   :  { %v117_v12 = vadd.f32 %v99_v11, %v98_v10 }
  0x30   :  { %118 = vadd.xlane.f32.xlu0 %v117_v12 }
  0x34   :  { %132 = vadd.xlane.f32.xlu0 %v131_v13 }
  0xb9   :  { %v119_v14 = vpop.xlane.xlu0 %118 }
  0xba   :  { %v120_v15 = vrot.slane %v119_v14, 4 }
  0xbc   :  { %v121_v16 = vadd.f32 %v120_v15, %v119_v14 }
  0xbd   :  { %v133_v17 = vpop.xlane.xlu0 %132 }
  0xbe   :  { %v122_v18 = vrot.slane %v121_v16, 2  ;;  %v134_v19 = vrot.slane %v133_v17, 4 }
  0xc0   :  { %v135_v20 = vadd.f32 %v134_v19, %v133_v17  ;;  %v123_v21 = vadd.f32 %v122_v18, %v121_v16 }
  0xc2   :  { %v136_v22 = vrot.slane %v135_v20, 2  ;;  %v124_v23 = vrot.slane %v123_v21, 1 }
  0xc4   :  { %v137_v24 = vadd.f32 %v136_v22, %v135_v20  ;;  %v125_v25 = vadd.f32 %v124_v23, %v123_v21 }
  0xc6   :  { %179 = vpush %v125_v25  ;;  %v138_v26 = vrot.slane %v137_v24, 1 }
  0xc8   :  { %v139_v27 = vadd.f32 %v138_v26, %v137_v24 }
  0xca   :  { %181 = vpush %v139_v27 }
  0xf7   :  { %s180_s29 = spop %179 }
  0xf8   :  { %v127_v28 = vstv %s180_s29 }
  0xf9   :  { %128 = vst [vmem:[#allocation10] sm:$0xff] %v127_v28 }
  0xfa   :  { %259 = shalt.err (!%p256_p5)
}
  0xfb   :  { %152 = dma.vmem_to_hbm [thread:$0]  %s150_s2, 128, %s344_s3, [#allocation6]  }
  0xfc   :  { %s182_s9 = spop %181  ;;  %s268_s10 = scalar_lea.vmem %s160_s5, 128 }
  0xfd   :  { %v141_v29 = vstv %s182_s9  ;;  %p269_p6 = scmp.ne.s32.totalorder %s160_s5, %s268_s10  ;;  %p273_p7 = scmp.lt.s32.totalorder %s160_s5, %s160_s5 }
  0xfe   :  { %142 = vst [vmem:[#allocation11] sm:$0xff] %v141_v29  ;;  %p274_p8 = scmp.lt.s32.totalorder %s268_s10, %s268_s10 }
 0x100   :  { %p275_p9 = por %p274_p8, %p273_p7 }
 0x102   :  { %p276_p10 = pnand %p275_p9, %p269_p6 }
 0x104   :  { %279 = shalt.err (!%p276_p10)
}
 0x105   :  { %162 = dma.vmem_to_hbm [thread:$0]  %s160_s5, 128, %s345_s4, [#allocation12]  }
 0x106   :  { %292 = dma.done.wait [#allocation6], 128  }
 0x107   :  { %293 = vsyncadd [#allocation6], 4294967168 }
 0x108   :  { %294 = dma.done.wait [#allocation12], 128  }
 0x109   :  { %295 = vsyncadd [#allocation12], 4294967168 }
 0x10a   :  { %169 = vsyncpa [#allocation5], 1 }
 0x10b   :  { %170 = vsyncpa [#allocation8], 1 }
 0x10c   :  { %171 = vsyncpa [#allocation6], 1 }
 0x10d   :  { %172 = vsyncpa [#allocation12], 1 }

</bundles_post_ra>
